<compile_context>
chip_gen: v5e
topology: v5e:2x2
jax: 0.10.0
libtpu: 0.0.40
codegen_flags: <defaults>
</compile_context>

<pallas_src>
import jax
import jax.numpy as jnp
from jax.experimental import pallas as pl
from jax.experimental.pallas import tpu as pltpu

_LANE = 128
_SUBLANE = 8
_VMEM_TILE_BUDGET = 24 * 1024 * 1024   # 2 IO arrays x 2 buffers, keep < v7x scoped VMEM
_VMEM_LIMIT_BYTES = 32 * 1024 * 1024   # explicit; within physical VMEM on all gens
_MAX_BLOCK_ROWS = 2048                 # ~85%+ of HBM roofline reached by 512-1024 rows


def _supact_kernel(x_ref, c0_ref, c1_ref, bh_ref, o_ref):
    x = x_ref[...]                                  # (block_rows, block_cols)
    xf = x.astype(jnp.float32)                      # keep math in f32 (v5e: no bf16 VPU/EUP)
    t = jnp.tanh(bh_ref[...] * xf)                  # one EUP op per element
    o_ref[...] = ((c0_ref[...] + c1_ref[...] * t) * xf).astype(o_ref.dtype)


def _pick_blocks(rows, cols, itemsize):
    """Pick (block_rows, block_cols): lane-dense, sublane-aligned, VMEM-bounded."""
    # Column tile: full width if 8 rows of it fit in the budget, else a 128-multiple.
    if cols <= _LANE or 4 * _SUBLANE * cols * itemsize <= _VMEM_TILE_BUDGET:
        block_cols = cols
    else:
        block_cols = (_VMEM_TILE_BUDGET // (4 * _SUBLANE * itemsize)) // _LANE * _LANE
        block_cols = max(_LANE, min(block_cols, cols))
    # Row tile: multiple of 8 sublanes, bounded by VMEM budget and a pipelining cap.
    if rows <= _SUBLANE:
        block_rows = rows
    else:
        max_rows = _VMEM_TILE_BUDGET // (4 * block_cols * itemsize)
        block_rows = min(rows, _MAX_BLOCK_ROWS, max_rows)
        block_rows = max(_SUBLANE, (block_rows // _SUBLANE) * _SUBLANE)
    return block_rows, block_cols


def supact(x, gamma, beta):
    """x: (B, F); gamma, beta: (F,).  Returns Supact(x) with the same shape/dtype."""
    B, F = x.shape
    gamma = gamma.astype(jnp.float32)
    beta = beta.astype(jnp.float32)
    # Folded parameters (tiny, computed once in the wrapper).
    c0 = 0.5 * (1.0 + gamma)
    c1 = 0.5 * (1.0 - gamma)
    bh = 0.5 * beta

    # ---- lane-dense layout plumbing -------------------------------------------------
    pad_cols = 0
    flattened = False
    if F % _LANE == 0:
        x2, c0r, c1r, bhr = x, c0, c1, bh
        rows, cols = B, F
    elif _LANE % F == 0 and (B * F) % _LANE == 0:
        rep = _LANE // F
        rows, cols = (B * F) // _LANE, _LANE
        x2 = x.reshape(rows, cols)
        c0r, c1r, bhr = (jnp.tile(v, rep) for v in (c0, c1, bh))
        flattened = True
    else:
        cols = pl.cdiv(F, _LANE) * _LANE
        pad_cols = cols - F
        rows = B
        x2 = jnp.pad(x, ((0, 0), (0, pad_cols)))
        c0r, c1r, bhr = (jnp.pad(v, (0, pad_cols)) for v in (c0, c1, bh))

    c0r = c0r.reshape(1, cols)
    c1r = c1r.reshape(1, cols)
    bhr = bhr.reshape(1, cols)

    block_rows, block_cols = _pick_blocks(rows, cols, x.dtype.itemsize)
    grid = (pl.cdiv(rows, block_rows), pl.cdiv(cols, block_cols))

    out = pl.pallas_call(
        _supact_kernel,
        out_shape=jax.ShapeDtypeStruct((rows, cols), x.dtype),
        grid_spec=pltpu.PrefetchScalarGridSpec(
            num_scalar_prefetch=0,
            grid=grid,
            in_specs=[
                pl.BlockSpec((block_rows, block_cols), lambda i, j: (i, j)),  # x tile
                pl.BlockSpec((1, block_cols), lambda i, j: (0, j)),           # c0 row
                pl.BlockSpec((1, block_cols), lambda i, j: (0, j)),           # c1 row
                pl.BlockSpec((1, block_cols), lambda i, j: (0, j)),           # bh row
            ],
            out_specs=pl.BlockSpec((block_rows, block_cols), lambda i, j: (i, j)),
        ),
        compiler_params=pltpu.CompilerParams(
            dimension_semantics=("parallel", "parallel"),
            vmem_limit_bytes=_VMEM_LIMIT_BYTES,
        ),
    )(x2, c0r, c1r, bhr)

    if flattened:
        out = out.reshape(B, F)
    elif pad_cols:
        out = out[:, :F]
    return out


def supact_ref(x, gamma, beta):
    inv = jax.nn.sigmoid(beta * x)
    fac = 1.0 - gamma
    mult = gamma + inv * fac
    return mult * x


if __name__ == "__main__":
    key = jax.random.PRNGKey(0)

    def run_case(B, F, key):
        kx, kg, kb = jax.random.split(key, 3)
        x = jax.random.normal(kx, (B, F), dtype=jnp.float32)
        # nn.Parameter init is gamma=ones, beta=zeros; perturb deterministically so
        # the activation is non-trivial while keeping the (in_size,) shapes.
        gamma = jnp.ones((F,), jnp.float32) + 0.1 * jax.random.normal(kg, (F,), jnp.float32)
        beta = jnp.zeros((F,), jnp.float32) + 0.5 * jax.random.normal(kb, (F,), jnp.float32)
        out = jax.block_until_ready(supact(x, gamma, beta))
        ref = supact_ref(x, gamma, beta)
        assert out.shape == (B, F) and out.dtype == jnp.float32
        assert jnp.allclose(out, ref, atol=1e-5, rtol=1e-5), f"mismatch at B={B}, F={F}"

    k1, k2, k3 = jax.random.split(key, 3)
    run_case(8, 32, k1)     # primary (module-consistent) shape: flatten-to-128-lanes path
    run_case(64, 256, k2)   # F already a multiple of 128: direct path
    run_case(16, 40, k3)    # F neither divides nor is divided by 128: padded path

    print("KERNEL_OK")
</pallas_src>

<mosaic_0001>
module attributes {stable_mosaic.version = 11 : i64} {
  func.func @_supact_kernel(%arg0: i32, %arg1: i32, %arg2: memref<2x128xf32, #tpu.memory_space<vmem>>, %arg3: memref<1x128xf32, #tpu.memory_space<vmem>>, %arg4: memref<1x128xf32, #tpu.memory_space<vmem>>, %arg5: memref<1x128xf32, #tpu.memory_space<vmem>>, %arg6: memref<2x128xf32, #tpu.memory_space<vmem>>) attributes {dimension_semantics = [#tpu.dimension_semantics<parallel>, #tpu.dimension_semantics<parallel>], iteration_bounds = array<i64: 1, 1>, scalar_prefetch = 0 : i64, scratch_operands = 0 : i64, tpu.core_type = #tpu.core_type<tc>, window_params = [{transform_indices = @transform_0, window_bounds = array<i64: 2, 128>}, {transform_indices = @transform_1, window_bounds = array<i64: 1, 128>}, {transform_indices = @transform_2, window_bounds = array<i64: 1, 128>}, {transform_indices = @transform_3, window_bounds = array<i64: 1, 128>}, {transform_indices = @transform_4, window_bounds = array<i64: 2, 128>}]} {
    %c0 = arith.constant 0 : index
    %c0_0 = arith.constant 0 : index
    %0 = vector.load %arg2[%c0, %c0_0] : memref<2x128xf32, #tpu.memory_space<vmem>>, vector<2x128xf32>
    %c0_1 = arith.constant 0 : index
    %c0_2 = arith.constant 0 : index
    %1 = vector.load %arg5[%c0_1, %c0_2] : memref<1x128xf32, #tpu.memory_space<vmem>>, vector<1x128xf32>
    %2 = vector.broadcast %1 : vector<1x128xf32> to vector<2x128xf32>
    %3 = arith.mulf %2, %0 : vector<2x128xf32>
    %4 = math.tanh %3 : vector<2x128xf32>
    %c0_3 = arith.constant 0 : index
    %c0_4 = arith.constant 0 : index
    %5 = vector.load %arg3[%c0_3, %c0_4] : memref<1x128xf32, #tpu.memory_space<vmem>>, vector<1x128xf32>
    %c0_5 = arith.constant 0 : index
    %c0_6 = arith.constant 0 : index
    %6 = vector.load %arg4[%c0_5, %c0_6] : memref<1x128xf32, #tpu.memory_space<vmem>>, vector<1x128xf32>
    %7 = vector.broadcast %6 : vector<1x128xf32> to vector<2x128xf32>
    %8 = arith.mulf %7, %4 : vector<2x128xf32>
    %9 = vector.broadcast %5 : vector<1x128xf32> to vector<2x128xf32>
    %10 = arith.addf %9, %8 : vector<2x128xf32>
    %11 = arith.mulf %10, %0 : vector<2x128xf32>
    %c0_7 = arith.constant 0 : index
    %c0_8 = arith.constant 0 : index
    %12 = vector.load %arg6[%c0_7, %c0_8] : memref<2x128xf32, #tpu.memory_space<vmem>>, vector<2x128xf32>
    tpu.vector_store %arg6[%c0_7, %c0_8], %11 {strides = array<i32>} : memref<2x128xf32, #tpu.memory_space<vmem>>, vector<2x128xf32>,
    return
  }
  func.func @transform_0(%arg0: i32, %arg1: i32) -> (i32, i32) {
    %c0_i32 = arith.constant 0 : i32
    return %arg0, %arg1 : i32, i32
  }
  func.func @transform_1(%arg0: i32, %arg1: i32) -> (i32, i32) {
    %c0_i32 = arith.constant 0 : i32
    %c0_i32_0 = arith.constant 0 : i32
    return %c0_i32, %arg1 : i32, i32
  }
  func.func @transform_2(%arg0: i32, %arg1: i32) -> (i32, i32) {
    %c0_i32 = arith.constant 0 : i32
    %c0_i32_0 = arith.constant 0 : i32
    return %c0_i32, %arg1 : i32, i32
  }
  func.func @transform_3(%arg0: i32, %arg1: i32) -> (i32, i32) {
    %c0_i32 = arith.constant 0 : i32
    %c0_i32_0 = arith.constant 0 : i32
    return %c0_i32, %arg1 : i32, i32
  }
  func.func @transform_4(%arg0: i32, %arg1: i32) -> (i32, i32) {
    %c0_i32 = arith.constant 0 : i32
    return %arg0, %arg1 : i32, i32
  }
}

</mosaic_0001>

<bundles_post_ra>
// kernel: tpu_custom_call.1
= control target key start
LH: loop header
LB: loop body
LE: loop exit
PB: predicated region body
PF: predicated region fallthrough
CT: control target
= control target key end

     0   :  { %9 = vsyncpa [#allocation3], 0  ;;  %s212_s0 = inlined_call_operand.hbm [shape: f32[2,128], index: 0, kind: input, shape index: {}]   ;;  %s213_s1 = inlined_call_operand.hbm [shape: f32[1,128], index: 1, kind: input, shape index: {}]   ;;  %s214_s2 = inlined_call_operand.vmem [shape: f32[1,128], index: 2, kind: input, shape index: {}]   ;;  %s215_s3 = inlined_call_operand.vmem [shape: f32[1,128], index: 3, kind: input, shape index: {}]   ;;  %s216_s4 = inlined_call_operand.hbm [shape: f32[2,128], index: 4, kind: output, shape index: {}]  }
   0x1   :  { %10 = vsyncpa [#allocation6], 0 }
   0x2   :  { %11 = vsyncpa [#allocation4], 0  ;;  %s17_s17 = sshll.u32 %s212_s0, 4  ;;  %s169_s18 = smov [#allocation2]   ;;  %s18_s17 = int_to_ptr.hbm [resolvable:$true] %s17_s17 }
   0x3   :  { %s19_s19 = sshll.u32 %s169_s18, 4  ;;  %s28_s22 = sshll.u32 %s213_s1, 4  ;;  %s20_s19 = int_to_ptr.vmem [resolvable:$true] %s19_s19  ;;  %s29_s22 = int_to_ptr.hbm [resolvable:$true] %s28_s22 }
   0x4   :  { %22 = dma.hbm_to_vmem [thread:$0]  %s18_s17, 32, %s20_s19, [#allocation3]  }
   0x5   :  { %s170_s23 = smov [#allocation5]  }
   0x6   :  { %s30_s24 = sshll.u32 %s170_s23, 4  ;;  %s31_s24 = int_to_ptr.vmem [resolvable:$true] %s30_s24 }
   0x7   :  { %33 = dma.hbm_to_vmem [thread:$0]  %s29_s22, 16, %s31_s24, [#allocation6]  }
   0x8   :  { %163 = dma.done.wait [#allocation3], 32  }
   0x9   :  { %164 = vsyncadd [#allocation3], 4294967264 }
   0xa   :  { %165 = dma.done.wait [#allocation6], 16  }
   0xb   :  { %166 = vsyncadd [#allocation6], 4294967280  ;;  %v46_v0 = vld [vmem:[#allocation2] sm:$0x3]  ;;  %v88_v4 = vld [vmem:[#allocation5] ss:$0 sm:$0xff] }
   0xc   :  { %v86_v1 = vld [vmem:[%s215_s3] ss:$0 sm:$0xff]  ;;  %s171_s1 = smov [#allocation7]   ;;  %s72_s5 = sshll.u32 %s216_s4, 4  ;;  %s73_s5 = int_to_ptr.hbm [resolvable:$true] %s72_s5 }
   0xd   :  { %v51_v2 = vmul.f32 %v86_v1, %v46_v0  ;;  %v87_v3 = vld [vmem:[%s214_s2] ss:$0 sm:$0xff]  ;;  %s70_s28 = sshll.u32 %s171_s1, 4  ;;  %s71_s28 = int_to_ptr.vmem [resolvable:$true] %s70_s28 }
   0xf   :  { %89 = vtanh.f32 %v51_v2 }
  0x15   :  { %v90_v5 = vpop.eup %89 }
  0x16   :  { %v58_v6 = vmul.f32 %v90_v5, %v87_v3 }
  0x18   :  { %v62_v7 = vadd.f32 %v88_v4, %v58_v6 }
  0x1a   :  { %v63_v8 = vmul.f32 %v62_v7, %v46_v0 }
  0x1c   :  { %64 = vst [vmem:[#allocation7] sm:$0x3] %v63_v8 }
  0x1d   :  { %75 = dma.vmem_to_hbm [thread:$0]  %s71_s28, 32, %s73_s5, [#allocation4]  }
  0x1e   :  { %167 = dma.done.wait [#allocation4], 32  }
  0x1f   :  { %168 = vsyncadd [#allocation4], 4294967264 }
  0x20   :  { %80 = vsyncpa [#allocation3], 1 }
  0x21   :  { %81 = vsyncpa [#allocation6], 1 }
  0x22   :  { %82 = vsyncpa [#allocation4], 1 }

</bundles_post_ra>
